<compile_context>
chip_gen: v7x
topology: tpu7x:2x2x1
jax: 0.10.0
libtpu: 0.0.40
codegen_flags: <defaults>
</compile_context>

<pallas_src>
import functools

import jax
import jax.numpy as jnp
from jax import lax
from jax.experimental import pallas as pl
from jax.experimental.pallas import tpu as pltpu


def _round_up(n: int, m: int) -> int:
    return ((n + m - 1) // m) * m


def _fused_mlp_kernel(*refs, num_layers: int, use_bias: bool):
    """One grid step: run the entire MLP on a [TB, D_in] batch tile.

    refs = (x_ref, W0[, b0], W1[, b1], ..., o_ref). Activations stay in
    vregs / VMEM for the whole layer stack (no HBM writeback between layers).
    """
    x_ref = refs[0]
    o_ref = refs[-1]
    params = refs[1:-1]

    h = x_ref[...]
    p = 0
    for layer in range(num_layers):
        w = params[p][...]          # [D_out, D_in] (nn.Linear layout)
        p += 1
        # y = x @ W.T without materializing the transpose: contract the last
        # axis of both operands (MXU-friendly, no XLU relayout of the tile).
        y = lax.dot_general(
            h.astype(w.dtype), w,
            dimension_numbers=(((1,), (1,)), ((), ())),
            preferred_element_type=jnp.float32)
        if use_bias:
            y = y + params[p][...]  # [1, D_out] broadcasts over batch rows
            p += 1
        if layer < num_layers - 1:
            y = jnp.maximum(y, 0.0)
        h = y
    o_ref[...] = h.astype(o_ref.dtype)


def fused_mlp_forward(x, w_list, b_list=None, *, batch_tile=512,
                      lane_multiple=128, compute_dtype=None):
    """ReLU-MLP forward (F.linear semantics) in one pallas_call.

    x: [B, D_in]; w_list[i]: [D_out_i, D_in_i]; b_list[i]: [D_out_i] or None.
    """
    use_bias = b_list is not None
    num_layers = len(w_list)
    B, Din = x.shape
    Dout = w_list[-1].shape[0]

    # Optional mixed precision: bf16 operands, f32 accumulation in the kernel.
    if compute_dtype is not None:
        x = x.astype(compute_dtype)
        w_list = [w.astype(compute_dtype) for w in w_list]

    # Pad the FINAL output dim to a lane-dense multiple of 128 so the only HBM
    # output uses full (unmasked) vector stores; sliced back afterwards.
    # Zero-padded rows of W / zeros of b only produce extra output columns
    # that are sliced away, so semantics are unchanged.
    Dout_pad = _round_up(Dout, lane_multiple)
    if Dout_pad != Dout:
        w_list = w_list[:-1] + [
            jnp.pad(w_list[-1], ((0, Dout_pad - Dout), (0, 0)))]
        if use_bias:
            b_list = b_list[:-1] + [
                jnp.pad(b_list[-1], (0, Dout_pad - Dout))]

    # Batch tiling: TB rows per grid step (multiple of 8 sublanes).
    TB = min(batch_tile, _round_up(B, 8))
    B_pad = _round_up(B, TB)
    if B_pad != B:
        x = jnp.pad(x, ((0, B_pad - B), (0, 0)))

    # Operands + BlockSpecs: x tiled over batch rows; W/b full-extent with a
    # constant index map -> DMA'd once, resident in VMEM across grid steps.
    operands = [x]
    in_specs = [pl.BlockSpec((TB, Din), lambda i: (i, 0))]
    for layer in range(num_layers):
        w = w_list[layer]
        operands.append(w)
        in_specs.append(pl.BlockSpec(w.shape, lambda i: (0, 0)))
        if use_bias:
            b2d = b_list[layer].reshape(1, w.shape[0]).astype(jnp.float32)
            operands.append(b2d)
            in_specs.append(pl.BlockSpec(b2d.shape, lambda i: (0, 0)))

    kernel = functools.partial(
        _fused_mlp_kernel, num_layers=num_layers, use_bias=use_bias)

    out = pl.pallas_call(
        kernel,
        out_shape=jax.ShapeDtypeStruct((B_pad, Dout_pad), jnp.float32),
        grid=(B_pad // TB,),
        in_specs=in_specs,
        out_specs=pl.BlockSpec((TB, Dout_pad), lambda i: (i, 0)),
        compiler_params=pltpu.CompilerParams(
            dimension_semantics=("parallel",)),
    )(*operands)

    return out[:B, :Dout]


class MainNetworkPallas:
    """JAX/Pallas port of MainNetwork (use_hnet=True path)."""

    def __init__(self, input_dim, output_dim, hidden_dims=(400, 400),
                 use_bias=True, use_hnet=True):
        self.input_dim = input_dim
        self.output_dim = output_dim
        self.hidden_dims = list(hidden_dims)
        self.use_bias = use_bias
        self.use_hnet = use_hnet
        self._param_shapes = []
        dims = [input_dim] + self.hidden_dims + [output_dim]
        for i in range(len(dims) - 1):
            self._param_shapes.append([dims[i + 1], dims[i]])
            if use_bias:
                self._param_shapes.append([dims[i + 1]])
        # TODO(synk): use_hnet=False branch (nn.Sequential with module-owned
        # parameters) is not exercised here; only the hypernetwork-weight
        # forward path is implemented in Pallas.

    @property
    def num_params(self):
        total = 0
        for s in self._param_shapes:
            n = 1
            for d in s:
                n *= d
            total += n
        return total

    def forward(self, x, weights, compute_dtype=None):
        assert isinstance(weights, list) and len(weights) == len(self._param_shapes)
        assert all(list(w.shape) == self._param_shapes[i]
                   for i, w in enumerate(weights))
        # Hypernet weights arrive interleaved [W0, b0, W1, b1, ...] exactly as
        # in the PyTorch module's _param_shapes ordering; split by ndim like
        # the reference forward does.
        w_list = [w for w in weights if w.ndim == 2]
        b_list = [w for w in weights if w.ndim == 1] if self.use_bias else None
        return fused_mlp_forward(x, w_list, b_list, compute_dtype=compute_dtype)


def _reference_forward(x, weights):
    w_list = [w for w in weights if w.ndim == 2]
    b_list = [w for w in weights if w.ndim == 1]
    n = len(w_list)
    for i in range(n):
        x = x @ w_list[i].T
        if b_list:
            x = x + b_list[i]
        if i < n - 1:
            x = jnp.maximum(x, 0.0)
    return x


if __name__ == "__main__":
    # Small shapes consistent with the module: an MLP over flat feature vectors.
    batch = 8
    input_dim = 32
    hidden_dims = [64, 64]
    output_dim = 16

    net = MainNetworkPallas(input_dim, output_dim, hidden_dims,
                            use_bias=True, use_hnet=True)

    key = jax.random.PRNGKey(0)
    key, kx = jax.random.split(key)
    x = jax.random.normal(kx, (batch, input_dim), dtype=jnp.float32)

    # Deterministic "hypernetwork" weights matching self._param_shapes.
    weights = []
    for shape in net._param_shapes:
        key, kw = jax.random.split(key)
        fan_in = shape[-1] if len(shape) == 2 else shape[0]
        scale = 1.0 / jnp.sqrt(jnp.float32(fan_in))
        weights.append(scale * jax.random.normal(kw, tuple(shape),
                                                 dtype=jnp.float32))

    out = net.forward(x, weights)
    out = jax.block_until_ready(out)

    ref = _reference_forward(x, weights)
    assert out.shape == (batch, output_dim)
    assert jnp.allclose(out, ref, atol=1e-4, rtol=1e-4)

    print("KERNEL_OK")
</pallas_src>

<mosaic_0001>
module attributes {stable_mosaic.version = 11 : i64} {
  func.func @_fused_mlp_kernel(%arg0: i32, %arg1: memref<8x32xf32, #tpu.memory_space<vmem>>, %arg2: memref<64x32xf32, #tpu.memory_space<vmem>>, %arg3: memref<1x64xf32, #tpu.memory_space<vmem>>, %arg4: memref<64x64xf32, #tpu.memory_space<vmem>>, %arg5: memref<1x64xf32, #tpu.memory_space<vmem>>, %arg6: memref<128x64xf32, #tpu.memory_space<vmem>>, %arg7: memref<1x128xf32, #tpu.memory_space<vmem>>, %arg8: memref<8x128xf32, #tpu.memory_space<vmem>>) attributes {dimension_semantics = [#tpu.dimension_semantics<parallel>], iteration_bounds = array<i64: 1>, scalar_prefetch = 0 : i64, scratch_operands = 0 : i64, tpu.core_type = #tpu.core_type<tc>, window_params = [{transform_indices = @transform_0, window_bounds = array<i64: 8, 32>}, {pipeline_mode = #tpu.pipeline_mode<synchronous>, transform_indices = @transform_1, window_bounds = array<i64: 64, 32>}, {pipeline_mode = #tpu.pipeline_mode<synchronous>, transform_indices = @transform_2, window_bounds = array<i64: 1, 64>}, {pipeline_mode = #tpu.pipeline_mode<synchronous>, transform_indices = @transform_3, window_bounds = array<i64: 64, 64>}, {pipeline_mode = #tpu.pipeline_mode<synchronous>, transform_indices = @transform_4, window_bounds = array<i64: 1, 64>}, {pipeline_mode = #tpu.pipeline_mode<synchronous>, transform_indices = @transform_5, window_bounds = array<i64: 128, 64>}, {pipeline_mode = #tpu.pipeline_mode<synchronous>, transform_indices = @transform_6, window_bounds = array<i64: 1, 128>}, {transform_indices = @transform_7, window_bounds = array<i64: 8, 128>}]} {
    %c0 = arith.constant 0 : index
    %c0_0 = arith.constant 0 : index
    %0 = vector.load %arg1[%c0, %c0_0] : memref<8x32xf32, #tpu.memory_space<vmem>>, vector<8x32xf32>
    %c0_1 = arith.constant 0 : index
    %c0_2 = arith.constant 0 : index
    %1 = vector.load %arg2[%c0_1, %c0_2] : memref<64x32xf32, #tpu.memory_space<vmem>>, vector<64x32xf32>
    %cst = arith.constant dense<0.000000e+00> : vector<8x64xf32>
    %2 = tpu.matmul %0, %1, %cst {dimension_numbers = #tpu.dot_dimension_numbers<[1], [1], [0], [0], [0, 0, 1, 0], [], []>} : vector<8x32xf32>, vector<64x32xf32>, vector<8x64xf32> -> vector<8x64xf32>
    %c0_3 = arith.constant 0 : index
    %c0_4 = arith.constant 0 : index
    %3 = vector.load %arg3[%c0_3, %c0_4] : memref<1x64xf32, #tpu.memory_space<vmem>>, vector<1x64xf32>
    %4 = vector.broadcast %3 : vector<1x64xf32> to vector<8x64xf32>
    %5 = arith.addf %2, %4 : vector<8x64xf32>
    %cst_5 = arith.constant 0.000000e+00 : f32
    %6 = vector.broadcast %cst_5 : f32 to vector<8x64xf32>
    %7 = arith.maximumf %5, %6 : vector<8x64xf32>
    %c0_6 = arith.constant 0 : index
    %c0_7 = arith.constant 0 : index
    %8 = vector.load %arg4[%c0_6, %c0_7] : memref<64x64xf32, #tpu.memory_space<vmem>>, vector<64x64xf32>
    %cst_8 = arith.constant dense<0.000000e+00> : vector<8x64xf32>
    %9 = tpu.matmul %7, %8, %cst_8 {dimension_numbers = #tpu.dot_dimension_numbers<[1], [1], [0], [0], [0, 0, 1, 0], [], []>} : vector<8x64xf32>, vector<64x64xf32>, vector<8x64xf32> -> vector<8x64xf32>
    %c0_9 = arith.constant 0 : index
    %c0_10 = arith.constant 0 : index
    %10 = vector.load %arg5[%c0_9, %c0_10] : memref<1x64xf32, #tpu.memory_space<vmem>>, vector<1x64xf32>
    %11 = vector.broadcast %10 : vector<1x64xf32> to vector<8x64xf32>
    %12 = arith.addf %9, %11 : vector<8x64xf32>
    %cst_11 = arith.constant 0.000000e+00 : f32
    %13 = vector.broadcast %cst_11 : f32 to vector<8x64xf32>
    %14 = arith.maximumf %12, %13 : vector<8x64xf32>
    %c0_12 = arith.constant 0 : index
    %c0_13 = arith.constant 0 : index
    %15 = vector.load %arg6[%c0_12, %c0_13] : memref<128x64xf32, #tpu.memory_space<vmem>>, vector<128x64xf32>
    %cst_14 = arith.constant dense<0.000000e+00> : vector<8x128xf32>
    %16 = tpu.matmul %14, %15, %cst_14 {dimension_numbers = #tpu.dot_dimension_numbers<[1], [1], [0], [0], [0, 0, 1, 0], [], []>} : vector<8x64xf32>, vector<128x64xf32>, vector<8x128xf32> -> vector<8x128xf32>
    %c0_15 = arith.constant 0 : index
    %c0_16 = arith.constant 0 : index
    %17 = vector.load %arg7[%c0_15, %c0_16] : memref<1x128xf32, #tpu.memory_space<vmem>>, vector<1x128xf32>
    %18 = vector.broadcast %17 : vector<1x128xf32> to vector<8x128xf32>
    %19 = arith.addf %16, %18 : vector<8x128xf32>
    %c0_17 = arith.constant 0 : index
    %c0_18 = arith.constant 0 : index
    %20 = vector.load %arg8[%c0_17, %c0_18] : memref<8x128xf32, #tpu.memory_space<vmem>>, vector<8x128xf32>
    tpu.vector_store %arg8[%c0_17, %c0_18], %19 {strides = array<i32>} : memref<8x128xf32, #tpu.memory_space<vmem>>, vector<8x128xf32>,
    return
  }
  func.func @transform_0(%arg0: i32) -> (i32, i32) {
    %c0_i32 = arith.constant 0 : i32
    %c0_i32_0 = arith.constant 0 : i32
    return %arg0, %c0_i32 : i32, i32
  }
  func.func @transform_1(%arg0: i32) -> (i32, i32) {
    %c0_i32 = arith.constant 0 : i32
    %c0_i32_0 = arith.constant 0 : i32
    %c0_i32_1 = arith.constant 0 : i32
    return %c0_i32, %c0_i32_0 : i32, i32
  }
  func.func @transform_2(%arg0: i32) -> (i32, i32) {
    %c0_i32 = arith.constant 0 : i32
    %c0_i32_0 = arith.constant 0 : i32
    %c0_i32_1 = arith.constant 0 : i32
    return %c0_i32, %c0_i32_0 : i32, i32
  }
  func.func @transform_3(%arg0: i32) -> (i32, i32) {
    %c0_i32 = arith.constant 0 : i32
    %c0_i32_0 = arith.constant 0 : i32
    %c0_i32_1 = arith.constant 0 : i32
    return %c0_i32, %c0_i32_0 : i32, i32
  }
  func.func @transform_4(%arg0: i32) -> (i32, i32) {
    %c0_i32 = arith.constant 0 : i32
    %c0_i32_0 = arith.constant 0 : i32
    %c0_i32_1 = arith.constant 0 : i32
    return %c0_i32, %c0_i32_0 : i32, i32
  }
  func.func @transform_5(%arg0: i32) -> (i32, i32) {
    %c0_i32 = arith.constant 0 : i32
    %c0_i32_0 = arith.constant 0 : i32
    %c0_i32_1 = arith.constant 0 : i32
    return %c0_i32, %c0_i32_0 : i32, i32
  }
  func.func @transform_6(%arg0: i32) -> (i32, i32) {
    %c0_i32 = arith.constant 0 : i32
    %c0_i32_0 = arith.constant 0 : i32
    %c0_i32_1 = arith.constant 0 : i32
    return %c0_i32, %c0_i32_0 : i32, i32
  }
  func.func @transform_7(%arg0: i32) -> (i32, i32) {
    %c0_i32 = arith.constant 0 : i32
    %c0_i32_0 = arith.constant 0 : i32
    return %arg0, %c0_i32 : i32, i32
  }
}

</mosaic_0001>

<bundles_post_ra>
// kernel: tpu_custom_call.1
= control target key start
LH: loop header
LB: loop body
LE: loop exit
PB: predicated region body
PF: predicated region fallthrough
CT: control target
= control target key end

     0   :  { %vm43_vm0 = vcmask 261120   ;;  %v653_v2 = vmov 0.0|0.0   ;;  %vm654_vm2 = vmmov 0   ;;  %v655_v5 = vmov 0.0   ;;  %s883_s0 = inlined_call_operand.vmem [shape: f32[8,32], index: 0, kind: input, shape index: {}]   ;;  %s884_s1 = inlined_call_operand.vmem [shape: f32[64,32], index: 1, kind: input, shape index: {}]   ;;  %s885_s2 = inlined_call_operand.vmem [shape: f32[1,64], index: 2, kind: input, shape index: {}]   ;;  %s886_s3 = inlined_call_operand.vmem [shape: f32[64,64], index: 3, kind: input, shape index: {}]   ;;  %s887_s4 = inlined_call_operand.vmem [shape: f32[1,64], index: 4, kind: input, shape index: {}]   ;;  %s888_s5 = inlined_call_operand.vmem [shape: f32[128,64], index: 5, kind: input, shape index: {}]   ;;  %s889_s6 = inlined_call_operand.vmem [shape: f32[1,128], index: 6, kind: input, shape index: {}]   ;;  %s890_s7 = inlined_call_operand.hbm [shape: f32[8,128], index: 7, kind: output, shape index: {}]  }
   0x1   :  { %v28_v0 = vld [vmem:[%s884_s1] sm:$0xff]  ;;  %v29_v1 = vld [vmem:[%s884_s1 + $0x8] sm:$0xff]  ;;  %561 = vmatprep.subr.bf16.mxu1 %v653_v2  ;;  %vm706_vm1 = vmpackc.low %vm43_vm0, %vm43_vm0  ;;  %593 = vmatprep.subr.bf16.mxu0 %v653_v2 }
   0x2   :  { %v562_v3 = vpack.c.bf16 %v29_v1, %v28_v0  ;;  %504 = vmatprep.mubr.msk.f32.mxu1 %vm654_vm2, %v655_v5  ;;  %558 = vmatprep.mubr.msk.f32.mxu0 %vm654_vm2, %v655_v5  ;;  %v30_v6 = vld [vmem:[%s884_s1 + $0x10] sm:$0xff]  ;;  %v31_v7 = vld [vmem:[%s884_s1 + $0x18] sm:$0xff] }
   0x4   :  { %564 = vmatpush3.bf16.xpose.msk.msra.mxu1 %vm706_vm1, %v562_v3 }
   0x5   :  { %565 = vmatprep.subr.bf16.mxu1 %v653_v2 }
   0x6   :  { %12 = vsyncpa [#allocation3], 0  ;;  %v566_v8 = vpack.c.bf16 %v31_v7, %v30_v6  ;;  %v32_v9 = vld [vmem:[%s884_s1 + $0x20] sm:$0xff]  ;;  %v33_v10 = vld [vmem:[%s884_s1 + $0x28] sm:$0xff]  ;;  %vm157_vm3 = vcmask 523264  }
   0x7   :  { %v570_v11 = vpack.c.bf16 %v33_v10, %v32_v9  ;;  %v34_v12 = vld [vmem:[%s884_s1 + $0x30] sm:$0xff]  ;;  %v35_v13 = vld [vmem:[%s884_s1 + $0x38] sm:$0xff]  ;;  %v142_v15 = vld [vmem:[%s886_s3] sm:$0xff] }
   0x8   :  { %v574_v14 = vpack.c.bf16 %v35_v13, %v34_v12  ;;  %v143_v16 = vld [vmem:[%s886_s3 + $0x8] sm:$0xff]  ;;  %v27_v17 = vld [vmem:[%s883_s0] sm:$0xff]  ;;  %vm754_vm4 = vmpackc.low %vm157_vm3, %vm157_vm3 }
   0x9   :  { %v578_v18 = vpack.c.bf16 %v143_v16, %v142_v15  ;;  %v144_v20 = vld [vmem:[%s886_s3 + $0x10] sm:$0xff]  ;;  %v145_v21 = vld [vmem:[%s886_s3 + $0x18] sm:$0xff]  ;;  %v146_v23 = vld [vmem:[%s886_s3 + $0x20] sm:$0xff] }
   0xa   :  { %v582_v22 = vpack.c.bf16 %v145_v21, %v144_v20  ;;  %v147_v24 = vld [vmem:[%s886_s3 + $0x28] sm:$0xff]  ;;  %v148_v26 = vld [vmem:[%s886_s3 + $0x30] sm:$0xff]  ;;  %v149_v27 = vld [vmem:[%s886_s3 + $0x38] sm:$0xff] }
   0xb   :  { %v586_v25 = vpack.c.bf16 %v147_v24, %v146_v23  ;;  %v590_v28 = vpack.c.bf16 %v149_v27, %v148_v26  ;;  %v256_v29 = vld [vmem:[%s888_s5] sm:$0xff]  ;;  %v257_v30 = vld [vmem:[%s888_s5 + $0x8] sm:$0xff]  ;;  %v258_v32 = vld [vmem:[%s888_s5 + $0x10] sm:$0xff] }
   0xc   :  { %568 = vmatpush3.bf16.xpose.msk.msra.mxu1 %vm706_vm1, %v566_v8  ;;  %v594_v31 = vpack.c.bf16 %v257_v30, %v256_v29  ;;  %v259_v33 = vld [vmem:[%s888_s5 + $0x18] sm:$0xff]  ;;  %v260_v35 = vld [vmem:[%s888_s5 + $0x20] sm:$0xff]  ;;  %v261_v36 = vld [vmem:[%s888_s5 + $0x28] sm:$0xff] }
   0xd   :  { %569 = vmatprep.subr.bf16.mxu1 %v653_v2  ;;  %v598_v34 = vpack.c.bf16 %v259_v33, %v258_v32  ;;  %v602_v37 = vpack.c.bf16 %v261_v36, %v260_v35  ;;  %v262_v38 = vld [vmem:[%s888_s5 + $0x30] sm:$0xff]  ;;  %v263_v39 = vld [vmem:[%s888_s5 + $0x38] sm:$0xff]  ;;  %v264_v41 = vld [vmem:[%s888_s5 + $0x40] sm:$0xff] }
   0xe   :  { %596 = vmatpush3.bf16.xpose.msk.msra.mxu0 %vm754_vm4, %v594_v31  ;;  %v606_v40 = vpack.c.bf16 %v263_v39, %v262_v38  ;;  %v265_v42 = vld [vmem:[%s888_s5 + $0x48] sm:$0xff]  ;;  %v266_v44 = vld [vmem:[%s888_s5 + $0x50] sm:$0xff]  ;;  %v267_v45 = vld [vmem:[%s888_s5 + $0x58] sm:$0xff] }
   0xf   :  { %597 = vmatprep.subr.bf16.mxu0 %v653_v2  ;;  %v610_v43 = vpack.c.bf16 %v265_v42, %v264_v41  ;;  %v614_v46 = vpack.c.bf16 %v267_v45, %v266_v44  ;;  %v268_v47 = vld [vmem:[%s888_s5 + $0x60] sm:$0xff]  ;;  %v269_v48 = vld [vmem:[%s888_s5 + $0x68] sm:$0xff]  ;;  %v270_v50 = vld [vmem:[%s888_s5 + $0x70] sm:$0xff] }
  0x10   :  { %v618_v49 = vpack.c.bf16 %v269_v48, %v268_v47  ;;  %v271_v51 = vld [vmem:[%s888_s5 + $0x78] sm:$0xff]  ;;  %v415_v53 = vld [vmem:[%s885_s2] ss:$0 sm:$0xff]  ;;  %s656_s2 = smov [#allocation2]  }
  0x11   :  { %v622_v52 = vpack.c.bf16 %v271_v51, %v270_v50  ;;  %v425_v58 = vld [vmem:[%s887_s4] ss:$0 sm:$0xff]  ;;  %s407_s20 = sshll.u32 %s656_s2, 4  ;;  %s408_s20 = int_to_ptr.vmem [resolvable:$true] %s407_s20 }
  0x12   :  { %v435_v63 = vld [vmem:[%s889_s6] ss:$0 sm:$0xff]  ;;  %s629_s21 = scalar_lea.vmem %s408_s20, 128  ;;  %p634_p1 = scmp.lt.s32.totalorder %s408_s20, %s408_s20 }
  0x13   :  { %p630_p0 = scmp.ne.s32.totalorder %s408_s20, %s629_s21  ;;  %p635_p2 = scmp.lt.s32.totalorder %s629_s21, %s629_s21 }
  0x14   :  { %572 = vmatpush3.bf16.xpose.msk.msra.mxu1 %vm706_vm1, %v570_v11 }
  0x15   :  { %573 = vmatprep.subr.bf16.mxu1 %v653_v2  ;;  %p636_p3 = por %p635_p2, %p634_p1 }
  0x16   :  { %600 = vmatpush3.bf16.xpose.msk.msra.mxu0 %vm754_vm4, %v598_v34 }
  0x17   :  { %601 = vmatprep.subr.bf16.mxu0 %v653_v2  ;;  %p637_p4 = pnand %p636_p3, %p630_p0 }
  0x1c   :  { %576 = vmatpush3.bf16.xpose.msk.msra.mxu1 %vm706_vm1, %v574_v14 }
  0x1d   :  { %577 = vmatprep.subr.bf16.mxu1 %v653_v2 }
  0x1e   :  { %604 = vmatpush3.bf16.xpose.msk.msra.mxu0 %vm754_vm4, %v602_v37 }
  0x1f   :  { %605 = vmatprep.subr.bf16.mxu0 %v653_v2 }
  0x23   :  { %505 = vmatmul.mubr.msk.f32.vlgmr.msra.gmra.mrb[0].mxu1 %vm43_vm0, %v27_v17 }
  0x24   :  { %580 = vmatpush3.bf16.xpose.msk.msra.mxu1 %vm754_vm4, %v578_v18  ;;  %523 = vmatprep.mubr.msk.f32.mxu1 %vm654_vm2, %v655_v5 }
  0x25   :  { %581 = vmatprep.subr.bf16.mxu1 %v653_v2 }
  0x26   :  { %608 = vmatpush3.bf16.xpose.msk.msra.mxu0 %vm754_vm4, %v606_v40 }
  0x27   :  { %609 = vmatprep.subr.bf16.mxu0 %v653_v2 }
  0x2c   :  { %584 = vmatpush3.bf16.xpose.msk.msra.mxu1 %vm754_vm4, %v582_v22 }
  0x2d   :  { %585 = vmatprep.subr.bf16.mxu1 %v653_v2 }
  0x2e   :  { %612 = vmatpush3.bf16.xpose.msk.msra.mxu0 %vm754_vm4, %v610_v43 }
  0x2f   :  { %613 = vmatprep.subr.bf16.mxu0 %v653_v2 }
  0x34   :  { %588 = vmatpush3.bf16.xpose.msk.msra.mxu1 %vm754_vm4, %v586_v25 }
  0x35   :  { %589 = vmatprep.subr.bf16.mxu1 %v653_v2 }
  0x36   :  { %616 = vmatpush3.bf16.xpose.msk.msra.mxu0 %vm754_vm4, %v614_v46 }
  0x37   :  { %617 = vmatprep.subr.bf16.mxu0 %v653_v2 }
  0x3c   :  { %592 = vmatpush3.bf16.xpose.msk.msra.mxu1 %vm754_vm4, %v590_v28 }
  0x3e   :  { %620 = vmatpush3.bf16.xpose.msk.msra.mxu0 %vm754_vm4, %v618_v49 }
  0x3f   :  { %621 = vmatprep.subr.bf16.mxu0 %v653_v2 }
  0x46   :  { %624 = vmatpush3.bf16.xpose.msk.msra.mxu0 %vm754_vm4, %v622_v52 }
  0xf6   :  { %v137_v54 = vpop.f32.mrb[0].mxu1 }
  0xf7   :  { %v138_v55 = vadd.f32 %v415_v53, %v137_v54  ;;  %v506_v56 = vpop.f32.mrb[1].mxu1 }
  0xf9   :  { %v141_v57 = vmax.f32 %v138_v55, 0.0 }
  0xfb   :  { %524 = vmatmul.mubr.msk.f32.vlgmr.msra.gmra.mrb[2].mxu1 %vm157_vm3, %v141_v57 }
 0x1ce   :  { %v251_v59 = vpop.f32.mrb[2].mxu1 }
 0x1cf   :  { %v252_v60 = vadd.f32 %v425_v58, %v251_v59  ;;  %v525_v61 = vpop.f32.mrb[3].mxu1 }
 0x1d1   :  { %v255_v62 = vmax.f32 %v252_v60, 0.0 }
 0x1d3   :  { %559 = vmatmul.mubr.msk.f32.vlgmr.msra.gmra.mrb[0].mxu0 %vm157_vm3, %v255_v62 }
 0x2a6   :  { %v396_v0 = vpop.f32.mrb[0].mxu0 }
 0x2a7   :  { %v397_v1 = vadd.f32 %v435_v63, %v396_v0  ;;  %v560_v2 = vpop.f32.mrb[1].mxu0 }
 0x2a9   :  { %400 = vst [vmem:[#allocation2] sm:$0xff] %v397_v1 }
 0x2aa   :  { %640 = shalt.err (!%p637_p4)
}
 0x2ab   :  { %s641_s1 = scalar_lea.hbm %s890_s7, 128 }
 0x2ac   :  { %p642_p5 = scmp.ne.s32.totalorder %s890_s7, %s641_s1  ;;  %p645_p6 = scmp.lt.u32.totalorder %s641_s1, %s890_s7 }
 0x2ae   :  { %p647_p7 = pnand %p645_p6, %p642_p5 }
 0x2b0   :  { %650 = shalt.err (!%p647_p7)
}
 0x2b1   :  { %410 = dma.vmem_to_hbm [thread:$0]  %s408_s20, 128, %s890_s7, [#allocation3]  }
 0x2b2   :  { %651 = dma.done.wait [#allocation3], 128  }
 0x2b3   :  { %652 = vsyncadd [#allocation3], 4294967168 }
 0x2b4   :  { %414 = vsyncpa [#allocation3], 1 }

</bundles_post_ra>
